<compile_context>
chip_gen: v7x
topology: tpu7x:2x2x1
jax: 0.10.0
libtpu: 0.0.40
codegen_flags: <defaults>
</compile_context>

<pallas_src>
import jax
import jax.numpy as jnp
from jax.experimental import pallas as pl
from jax.experimental.pallas import tpu as pltpu


def _hbm_copy_kernel(x_hbm_ref, o_hbm_ref, sem):
    # Single HBM->HBM async DMA: no VMEM staging, no grid, no vld/vst usage.
    # Bound purely by HBM read+write bandwidth on every TPU generation.
    cp = pltpu.make_async_copy(x_hbm_ref, o_hbm_ref, sem)
    cp.start()
    cp.wait()


def pallas_passthrough(x):
    """Identity copy as one HBM->HBM DMA (no BlockSpec pipeline, no VMEM round trip).

    Both operands stay in place (memory_space=pl.ANY); the kernel body only
    issues and awaits a single DMA.  This is the fastest possible standalone
    copy and is independent of batch size, lane width, or dtype packing.
    """
    return pl.pallas_call(
        _hbm_copy_kernel,
        out_shape=jax.ShapeDtypeStruct(x.shape, x.dtype),
        in_specs=[pl.BlockSpec(memory_space=pl.ANY)],
        out_specs=pl.BlockSpec(memory_space=pl.ANY),
        scratch_shapes=[pltpu.SemaphoreType.DMA],
        compiler_params=pltpu.CompilerParams(has_side_effects=True),
    )(x)


class TransitionRecurrentTransformerPallas:
    """JAX/Pallas mirror of the (stub) PyTorch TransitionRecurrent_Transformer."""

    def __init__(self, num_slots, slot_dim, hidden_dim, **kwargs):
        self.num_slots = num_slots
        self.slot_dim = slot_dim
        self.hidden_dim = hidden_dim
        # No parameters: the reference __init__ registers none.

    def init_mem(self, batch_size):
        return None

    def forward(self, x, mem):
        # Reference forward body is `pass` -> returns None.  The fastest kernel
        # here is *no* kernel: launching anything for a discarded value would be
        # pure wasted HBM traffic.
        # TODO(synk): reference forward body is `pass`; no transition /
        # transformer math exists in the source module to translate.
        return None


if __name__ == "__main__":
    key = jax.random.PRNGKey(0)

    batch = 2
    num_slots = 4
    slot_dim = 32
    hidden_dim = 32

    x = jax.random.normal(key, (batch, num_slots, slot_dim), dtype=jnp.float32)

    module = TransitionRecurrentTransformerPallas(num_slots, slot_dim, hidden_dim)
    mem = module.init_mem(batch)   # None, matching reference init_mem
    out = module.forward(x, mem)   # None, matching `pass`
    assert out is None
    assert mem is None

    # Exercise the Pallas TPU path once (single HBM->HBM DMA identity copy),
    # outside the module's forward semantics, purely to validate the pipeline.
    x_copied = pallas_passthrough(x)
    x_copied = jax.block_until_ready(x_copied)

    assert x_copied.shape == x.shape
    assert bool(jnp.allclose(x_copied, x)), "Pallas pass-through mismatch"

    print("KERNEL_OK")
</pallas_src>

<mosaic_0001>
module attributes {stable_mosaic.version = 11 : i64} {
  func.func @_hbm_copy_kernel(%arg0: memref<2x4x32xf32, #tpu.memory_space<any>>, %arg1: memref<2x4x32xf32, #tpu.memory_space<any>>, %arg2: memref<!tpu.dma_semaphore, #tpu.memory_space<semaphore_mem>>) attributes {dimension_semantics = [], scalar_prefetch = 0 : i64, scratch_operands = 1 : i64, tpu.core_type = #tpu.core_type<tc>} {
    tpu.enqueue_dma source(%arg0 : memref<2x4x32xf32, #tpu.memory_space<any>>) target(%arg1 : memref<2x4x32xf32, #tpu.memory_space<any>>) target_semaphore(%arg2 : memref<!tpu.dma_semaphore, #tpu.memory_space<semaphore_mem>>)
    tpu.wait_dma2 semaphore(%arg2 : memref<!tpu.dma_semaphore, #tpu.memory_space<semaphore_mem>>) src(%arg0 : memref<2x4x32xf32, #tpu.memory_space<any>>) dst(%arg1 : memref<2x4x32xf32, #tpu.memory_space<any>>)
    return
  }
}

</mosaic_0001>

<bundles_post_ra>
// kernel: tpu_custom_call.1
= control target key start
LH: loop header
LB: loop body
LE: loop exit
PB: predicated region body
PF: predicated region fallthrough
CT: control target
= control target key end

     0   :  { %s35_s6 = smov [#allocation2]   ;;  %s36_s7 = smov [#allocation3]   ;;  %s54_s0 = inlined_call_operand.hbm [shape: f32[2,4,32], index: 0, kind: input, shape index: {}]   ;;  %s55_s1 = inlined_call_operand.hbm [shape: f32[2,4,32], index: 1, kind: output, shape index: {}]  }
   0x1   :  { %s37_s8 = smov 0  }
   0x2   :  { %18 = dma.general %s54_s0, 128, %s55_s1, %s35_s6, %s36_s7, [#allocation4], %s37_s8, 0  }
   0x3   :  { %33 = dma.done.wait [#allocation2], 128 }
   0x4   :  { %34 = vsyncadd [#allocation2], 4294967168 }
   0x5   :  { %23 = vsyncmov [#allocation2] }
   0x8   :  { %s24_s13 = vpop.sfrf %23 }
   0x9   :  { %p29_p0 = scmp.ne.s32.totalorder %s24_s13, 0 }
   0xb   :  { %28 = shalt.err (%p29_p0)  }

</bundles_post_ra>
